<compile_context>
chip_gen: v7x
topology: tpu7x:2x2x1
jax: 0.10.0
libtpu: 0.0.40
codegen_flags: <defaults>
</compile_context>

<pallas_src>
import jax
import jax.numpy as jnp
from jax import lax
from jax.experimental import pallas as pl
from jax.experimental.pallas import tpu as pltpu

# real model sizes (from the PyTorch module)
H = 8      # hidden_size
IN = 3     # input_size
OUT = 1    # linear output features

# TPU-padded sizes
BP = 8     # batch padded to one sublane tile (up to 8 sequences per call)
HP = 128   # lane tile
KP = 8     # padded input contraction dim (3 -> 8)

# lane layout
L0 = 0         # layer-0 gates occupy lanes [0, 32): i|f|g|o
L1 = 32        # layer-1 gates occupy lanes [32, 64): i|f|g|o
HPOS = H       # h/c live at gate_base + H (the f-gate block), width H

# packed parameter array row offsets (one (128,128) f32 array)
R_WIN0 = 0     # ( 8,128) x        -> layer-0 gates (lanes 0:32)
R_WHH0 = 8     # (16,128) h0(t-1)  -> layer-0 gates          (h0 at rows 8:16)
R_WMIX = 24    # (48,128) [h0(t) | h1(t-1)] -> layer-1 gates (rows 8:16, 40:48)
R_WLIN = 72    # (48,128) h1(T-1)  -> output lane 0          (rows 40:48)
R_VEC = 120    # ( 8,128) rows: b0, b1, blin, sc, off
R_TOTAL = 128


# ------------------------------ Pallas kernel ------------------------------ #
def dst_lstm_kernel(x_ref, p_ref, out_ref):
    """x_ref: (T*BP, KP) time-major padded input; p_ref: (128,128) packed
    params; out_ref: (BP, HP) padded output (real value in [:B, :OUT])."""
    T = x_ref.shape[0] // BP

    # Single packed parameter block -> static slices (all offsets 8-aligned).
    w_in0 = p_ref[R_WIN0:R_WHH0, :]       # ( 8,128)
    w_hh0 = p_ref[R_WHH0:R_WMIX, :]       # (16,128)
    w_mix = p_ref[R_WMIX:R_WLIN, :]       # (48,128)
    w_lin = p_ref[R_WLIN:R_VEC, :]        # (48,128)
    vec = p_ref[R_VEC:R_TOTAL, :]         # ( 8,128)

    b0 = vec[0:1, :]                                         # (1,128)
    b1 = jnp.broadcast_to(vec[1:2, :], (BP, HP))             # hoisted broadcasts
    blin = vec[2:3, :]
    sc = jnp.broadcast_to(vec[3:4, :], (BP, HP))
    off = jnp.broadcast_to(vec[4:5, :], (BP, HP))

    # Loop-invariant lane selector for assembling the fused layer-1 LHS:
    # lanes [40,48) take h1(t-1), everything else takes h0(t).
    lane = lax.broadcasted_iota(jnp.int32, (BP, HP), 1)
    sel_h1 = jnp.logical_and(lane >= L1 + HPOS, lane < L1 + HPOS + H)

    # Hoisted layer-0 input projection for ALL timesteps: one (T*8,8)@(8,128)
    # matmul off the serial chain (bias b0 folded in; 0.5 sigmoid scaling is
    # already folded into the packed weights/biases).
    xw0 = jnp.dot(x_ref[...], w_in0, preferred_element_type=jnp.float32) + b0

    def cell(pre, c):
        # pre: packed gate pre-activations (gates at some 32-lane block with
        # i|f|g|o layout); c: cell state stored at the f-gate lanes.
        act = jnp.tanh(pre) * sc + off                 # sigmoid(i/f/o), tanh(g)
        rot = pltpu.roll(act, shift=HP - 2 * H, axis=1)   # g -> base, o -> base+H
        ig = pltpu.roll(act * rot, shift=H, axis=1)       # i*g -> base+H
        c_new = act * c + ig                               # f*c + i*g  (at base+H)
        h = rot * jnp.tanh(c_new)                          # o*tanh(c') (at base+H)
        return h, c_new

    z = jnp.zeros((BP, HP), jnp.float32)
    h0, c0, h1, c1 = z, z, z, z
    for t in range(T):                                 # T = 8: fully unrolled
        # ---- layer 0: h0(t-1) @ Whh0 (input part hoisted into xw0) ----
        if t == 0:
            pre0 = xw0[0:BP, :]                        # h0(-1) == 0
        else:
            pre0 = (jnp.dot(h0[:, :2 * H], w_hh0,
                            preferred_element_type=jnp.float32)
                    + xw0[t * BP:(t + 1) * BP, :])
        h0, c0 = cell(pre0, c0)

        # ---- layer 1: ONE fused matmul = h0(t)@Wih1 + h1(t-1)@Whh1 ----
        mixed = jnp.where(sel_h1, h1, h0)              # h0 @ lanes 8:16, h1 @ 40:48
        pre1 = (jnp.dot(mixed[:, :L1 + 2 * H], w_mix,
                        preferred_element_type=jnp.float32) + b1)
        h1, c1 = cell(pre1, c1)

    # Dropout(0.2) is identity at inference; final Linear(8 -> 1) reads h1
    # from lanes [40,48).
    out_ref[...] = (jnp.dot(h1[:, :L1 + 2 * H], w_lin,
                            preferred_element_type=jnp.float32) + blin)


# ------------------------------ host wrapper ------------------------------- #
def dst_forward_pallas(x, packed_params):
    """x: (B, T, 3) float32 with B <= 8 -> (B, 1) float32 (eval-mode)."""
    B, T, F = x.shape
    assert B <= BP and F == IN

    # time-major + pad: batch -> 8 sublanes, input 3 -> 8 lanes, T folded into
    # the sublane axis so the hoisted layer-0 projection is one matmul.
    xp = jnp.zeros((T, BP, KP), jnp.float32)
    xp = xp.at[:, :B, :IN].set(jnp.transpose(x, (1, 0, 2)).astype(jnp.float32))
    xp = xp.reshape(T * BP, KP)

    vmem = pltpu.MemorySpace.VMEM
    out = pl.pallas_call(
        dst_lstm_kernel,
        out_shape=jax.ShapeDtypeStruct((BP, HP), jnp.float32),
        in_specs=[pl.BlockSpec(memory_space=vmem),
                  pl.BlockSpec(memory_space=vmem)],
        out_specs=pl.BlockSpec(memory_space=vmem),
    )(xp, packed_params)
    return out[:B, :OUT]


# --------------------------- parameter handling ----------------------------- #
def init_params(key):
    """Deterministic params with PyTorch nn.LSTM / nn.Linear layouts."""
    ks = jax.random.split(key, 10)
    bound = 1.0 / jnp.sqrt(jnp.float32(H))

    def u(k, shape):
        return jax.random.uniform(k, shape, jnp.float32, -bound, bound)

    return {
        # layer 0 (input_size = 3), PyTorch gate order i, f, g, o
        "wih0": u(ks[0], (4 * H, IN)), "whh0": u(ks[1], (4 * H, H)),
        "bih0": u(ks[2], (4 * H,)),    "bhh0": u(ks[3], (4 * H,)),
        # layer 1 (input_size = 8)
        "wih1": u(ks[4], (4 * H, H)),  "whh1": u(ks[5], (4 * H, H)),
        "bih1": u(ks[6], (4 * H,)),    "bhh1": u(ks[7], (4 * H,)),
        # linear 8 -> 1
        "wlin": u(ks[8], (OUT, H)),    "blin": u(ks[9], (OUT,)),
    }


def pack_params(p):
    """Pack ALL params into one (128,128) f32 array (single prologue DMA).

    - gate columns follow PyTorch order i|f|g|o; i/f/o columns are pre-scaled
      by 0.5 so that sigmoid(z) == 0.5*tanh(pre)+0.5 with pre = 0.5*z.
    - weight rows are placed at the lane offsets where the kernel keeps the
      corresponding hidden state (h at the f-gate block); all other rows stay
      zero so garbage LHS lanes contribute nothing.
    """
    sgate = jnp.full((4 * H,), 0.5, jnp.float32).at[2 * H:3 * H].set(1.0)

    P = jnp.zeros((R_TOTAL, HP), jnp.float32)
    # layer-0 input projection: x dims -> layer-0 gate lanes
    P = P.at[R_WIN0:R_WIN0 + IN, L0:L0 + 4 * H].set(p["wih0"].T * sgate)
    # layer-0 recurrence: h0 (LHS lanes 8:16) -> layer-0 gate lanes
    P = P.at[R_WHH0 + HPOS:R_WHH0 + HPOS + H,
             L0:L0 + 4 * H].set(p["whh0"].T * sgate)
    # fused layer-1 projection: h0(t) (lanes 8:16) and h1(t-1) (lanes 40:48)
    P = P.at[R_WMIX + HPOS:R_WMIX + HPOS + H,
             L1:L1 + 4 * H].set(p["wih1"].T * sgate)
    P = P.at[R_WMIX + L1 + HPOS:R_WMIX + L1 + HPOS + H,
             L1:L1 + 4 * H].set(p["whh1"].T * sgate)
    # final linear: h1 (lanes 40:48) -> output lane 0
    P = P.at[R_WLIN + L1 + HPOS:R_WLIN + L1 + HPOS + H, :OUT].set(p["wlin"].T)
    # bias / constant rows
    P = P.at[R_VEC + 0, L0:L0 + 4 * H].set((p["bih0"] + p["bhh0"]) * sgate)
    P = P.at[R_VEC + 1, L1:L1 + 4 * H].set((p["bih1"] + p["bhh1"]) * sgate)
    P = P.at[R_VEC + 2, :OUT].set(p["blin"])
    sc = jnp.full((HP,), 0.5, jnp.float32)
    sc = sc.at[L0 + 2 * H:L0 + 3 * H].set(1.0)
    sc = sc.at[L1 + 2 * H:L1 + 3 * H].set(1.0)
    off = jnp.full((HP,), 0.5, jnp.float32)
    off = off.at[L0 + 2 * H:L0 + 3 * H].set(0.0)
    off = off.at[L1 + 2 * H:L1 + 3 * H].set(0.0)
    P = P.at[R_VEC + 3].set(sc)
    P = P.at[R_VEC + 4].set(off)
    return P


# -------------------------------- reference --------------------------------- #
def dst_forward_ref(x, p):
    """Pure-JAX reference matching PyTorch LSTM semantics (eval mode)."""
    B, T, _ = x.shape

    def cellr(x_t, h, c, wih, whh, bih, bhh):
        g = x_t @ wih.T + h @ whh.T + bih + bhh
        i = jax.nn.sigmoid(g[:, 0 * H:1 * H])
        f = jax.nn.sigmoid(g[:, 1 * H:2 * H])
        gg = jnp.tanh(g[:, 2 * H:3 * H])
        o = jax.nn.sigmoid(g[:, 3 * H:4 * H])
        c = f * c + i * gg
        h = o * jnp.tanh(c)
        return h, c

    h0 = c0 = h1 = c1 = jnp.zeros((B, H), jnp.float32)
    for t in range(T):
        h0, c0 = cellr(x[:, t], h0, c0, p["wih0"], p["whh0"], p["bih0"], p["bhh0"])
        h1, c1 = cellr(h0, h1, c1, p["wih1"], p["whh1"], p["bih1"], p["bhh1"])
    return h1 @ p["wlin"].T + p["blin"]


# ----------------------------------- main ------------------------------------ #
if __name__ == "__main__":
    key = jax.random.PRNGKey(0)
    k_x, k_p = jax.random.split(key)

    B, T = 2, 8
    x = jax.random.normal(k_x, (B, T, IN), jnp.float32)

    params = init_params(k_p)
    kparams = pack_params(params)

    out = jax.block_until_ready(dst_forward_pallas(x, kparams))
    ref = dst_forward_ref(x, params)

    assert out.shape == (B, OUT)
    assert jnp.allclose(out, ref, atol=1e-4, rtol=1e-4), (out, ref)
    print("KERNEL_OK")
</pallas_src>

<mosaic_0001>
module attributes {stable_mosaic.version = 11 : i64} {
  func.func @dst_lstm_kernel(%arg0: memref<64x8xf32, #tpu.memory_space<vmem>>, %arg1: memref<128x128xf32, #tpu.memory_space<vmem>>, %arg2: memref<8x128xf32, #tpu.memory_space<vmem>>) attributes {dimension_semantics = [], scalar_prefetch = 0 : i64, scratch_operands = 0 : i64, tpu.core_type = #tpu.core_type<tc>} {
    %c0 = arith.constant 0 : index
    %c0_0 = arith.constant 0 : index
    %0 = vector.load %arg1[%c0, %c0_0] : memref<128x128xf32, #tpu.memory_space<vmem>>, vector<8x128xf32>
    %c8 = arith.constant 8 : index
    %c0_1 = arith.constant 0 : index
    %1 = vector.load %arg1[%c8, %c0_1] : memref<128x128xf32, #tpu.memory_space<vmem>>, vector<16x128xf32>
    %c24 = arith.constant 24 : index
    %c0_2 = arith.constant 0 : index
    %2 = vector.load %arg1[%c24, %c0_2] : memref<128x128xf32, #tpu.memory_space<vmem>>, vector<48x128xf32>
    %c72 = arith.constant 72 : index
    %c0_3 = arith.constant 0 : index
    %3 = vector.load %arg1[%c72, %c0_3] : memref<128x128xf32, #tpu.memory_space<vmem>>, vector<48x128xf32>
    %c120 = arith.constant 120 : index
    %c0_4 = arith.constant 0 : index
    %4 = vector.load %arg1[%c120, %c0_4] : memref<128x128xf32, #tpu.memory_space<vmem>>, vector<8x128xf32>
    %5 = vector.extract_strided_slice %4 {offsets = [0, 0], sizes = [1, 128], strides = [1, 1]} : vector<8x128xf32> to vector<1x128xf32>
    %6 = vector.extract_strided_slice %4 {offsets = [1, 0], sizes = [1, 128], strides = [1, 1]} : vector<8x128xf32> to vector<1x128xf32>
    %7 = vector.shape_cast %6 : vector<1x128xf32> to vector<1x128xf32>
    %8 = vector.broadcast %7 : vector<1x128xf32> to vector<8x128xf32>
    %9 = vector.extract_strided_slice %4 {offsets = [2, 0], sizes = [1, 128], strides = [1, 1]} : vector<8x128xf32> to vector<1x128xf32>
    %10 = vector.extract_strided_slice %4 {offsets = [3, 0], sizes = [1, 128], strides = [1, 1]} : vector<8x128xf32> to vector<1x128xf32>
    %11 = vector.shape_cast %10 : vector<1x128xf32> to vector<1x128xf32>
    %12 = vector.broadcast %11 : vector<1x128xf32> to vector<8x128xf32>
    %13 = vector.extract_strided_slice %4 {offsets = [4, 0], sizes = [1, 128], strides = [1, 1]} : vector<8x128xf32> to vector<1x128xf32>
    %14 = vector.shape_cast %13 : vector<1x128xf32> to vector<1x128xf32>
    %15 = vector.broadcast %14 : vector<1x128xf32> to vector<8x128xf32>
    %16 = tpu.iota {dimensions = array<i32: 1>} : vector<8x128xi32>
    %c40_i32 = arith.constant 40 : i32
    %17 = vector.broadcast %c40_i32 : i32 to vector<8x128xi32>
    %18 = arith.cmpi sge, %16, %17 : vector<8x128xi32>
    %c48_i32 = arith.constant 48 : i32
    %19 = vector.broadcast %c48_i32 : i32 to vector<8x128xi32>
    %20 = arith.cmpi slt, %16, %19 : vector<8x128xi32>
    %21 = arith.andi %18, %20 : vector<8x128xi1>
    %c0_5 = arith.constant 0 : index
    %c0_6 = arith.constant 0 : index
    %22 = vector.load %arg0[%c0_5, %c0_6] : memref<64x8xf32, #tpu.memory_space<vmem>>, vector<64x8xf32>
    %cst = arith.constant dense<0.000000e+00> : vector<64x128xf32>
    %23 = tpu.matmul %22, %0, %cst {dimension_numbers = #tpu.dot_dimension_numbers<[1], [0], [0], [1], [0, 0, 1, 1], [], []>} : vector<64x8xf32>, vector<8x128xf32>, vector<64x128xf32> -> vector<64x128xf32>
    %24 = vector.broadcast %5 : vector<1x128xf32> to vector<64x128xf32>
    %25 = arith.addf %23, %24 : vector<64x128xf32>
    %cst_7 = arith.constant 0.000000e+00 : f32
    %26 = vector.broadcast %cst_7 : f32 to vector<8x128xf32>
    %27 = vector.extract_strided_slice %25 {offsets = [0, 0], sizes = [8, 128], strides = [1, 1]} : vector<64x128xf32> to vector<8x128xf32>
    %28 = math.tanh %27 : vector<8x128xf32>
    %29 = arith.mulf %28, %12 : vector<8x128xf32>
    %30 = arith.addf %29, %15 : vector<8x128xf32>
    %c112_i32 = arith.constant 112 : i32
    %31 = tpu.dynamic_rotate %30 by %c112_i32 dim 1 : vector<8x128xf32>, i32 -> vector<8x128xf32>
    %32 = arith.mulf %30, %31 : vector<8x128xf32>
    %c8_i32 = arith.constant 8 : i32
    %33 = tpu.dynamic_rotate %32 by %c8_i32 dim 1 : vector<8x128xf32>, i32 -> vector<8x128xf32>
    %34 = arith.mulf %30, %26 : vector<8x128xf32>
    %35 = arith.addf %34, %33 : vector<8x128xf32>
    %36 = math.tanh %35 : vector<8x128xf32>
    %37 = arith.mulf %31, %36 : vector<8x128xf32>
    %38 = arith.select %21, %26, %37 : vector<8x128xi1>, vector<8x128xf32>
    %39 = vector.extract_strided_slice %38 {offsets = [0, 0], sizes = [8, 48], strides = [1, 1]} : vector<8x128xf32> to vector<8x48xf32>
    %cst_8 = arith.constant dense<0.000000e+00> : vector<8x128xf32>
    %40 = tpu.matmul %39, %2, %cst_8 {dimension_numbers = #tpu.dot_dimension_numbers<[1], [0], [0], [1], [0, 0, 1, 1], [], []>} : vector<8x48xf32>, vector<48x128xf32>, vector<8x128xf32> -> vector<8x128xf32>
    %41 = arith.addf %40, %8 : vector<8x128xf32>
    %42 = math.tanh %41 : vector<8x128xf32>
    %43 = arith.mulf %42, %12 : vector<8x128xf32>
    %44 = arith.addf %43, %15 : vector<8x128xf32>
    %c112_i32_9 = arith.constant 112 : i32
    %45 = tpu.dynamic_rotate %44 by %c112_i32_9 dim 1 : vector<8x128xf32>, i32 -> vector<8x128xf32>
    %46 = arith.mulf %44, %45 : vector<8x128xf32>
    %c8_i32_10 = arith.constant 8 : i32
    %47 = tpu.dynamic_rotate %46 by %c8_i32_10 dim 1 : vector<8x128xf32>, i32 -> vector<8x128xf32>
    %48 = arith.mulf %44, %26 : vector<8x128xf32>
    %49 = arith.addf %48, %47 : vector<8x128xf32>
    %50 = math.tanh %49 : vector<8x128xf32>
    %51 = arith.mulf %45, %50 : vector<8x128xf32>
    %52 = vector.extract_strided_slice %37 {offsets = [0, 0], sizes = [8, 16], strides = [1, 1]} : vector<8x128xf32> to vector<8x16xf32>
    %cst_11 = arith.constant dense<0.000000e+00> : vector<8x128xf32>
    %53 = tpu.matmul %52, %1, %cst_11 {dimension_numbers = #tpu.dot_dimension_numbers<[1], [0], [0], [1], [0, 0, 1, 1], [], []>} : vector<8x16xf32>, vector<16x128xf32>, vector<8x128xf32> -> vector<8x128xf32>
    %54 = vector.extract_strided_slice %25 {offsets = [8, 0], sizes = [8, 128], strides = [1, 1]} : vector<64x128xf32> to vector<8x128xf32>
    %55 = arith.addf %53, %54 : vector<8x128xf32>
    %56 = math.tanh %55 : vector<8x128xf32>
    %57 = arith.mulf %56, %12 : vector<8x128xf32>
    %58 = arith.addf %57, %15 : vector<8x128xf32>
    %c112_i32_12 = arith.constant 112 : i32
    %59 = tpu.dynamic_rotate %58 by %c112_i32_12 dim 1 : vector<8x128xf32>, i32 -> vector<8x128xf32>
    %60 = arith.mulf %58, %59 : vector<8x128xf32>
    %c8_i32_13 = arith.constant 8 : i32
    %61 = tpu.dynamic_rotate %60 by %c8_i32_13 dim 1 : vector<8x128xf32>, i32 -> vector<8x128xf32>
    %62 = arith.mulf %58, %35 : vector<8x128xf32>
    %63 = arith.addf %62, %61 : vector<8x128xf32>
    %64 = math.tanh %63 : vector<8x128xf32>
    %65 = arith.mulf %59, %64 : vector<8x128xf32>
    %66 = arith.select %21, %51, %65 : vector<8x128xi1>, vector<8x128xf32>
    %67 = vector.extract_strided_slice %66 {offsets = [0, 0], sizes = [8, 48], strides = [1, 1]} : vector<8x128xf32> to vector<8x48xf32>
    %cst_14 = arith.constant dense<0.000000e+00> : vector<8x128xf32>
    %68 = tpu.matmul %67, %2, %cst_14 {dimension_numbers = #tpu.dot_dimension_numbers<[1], [0], [0], [1], [0, 0, 1, 1], [], []>} : vector<8x48xf32>, vector<48x128xf32>, vector<8x128xf32> -> vector<8x128xf32>
    %69 = arith.addf %68, %8 : vector<8x128xf32>
    %70 = math.tanh %69 : vector<8x128xf32>
    %71 = arith.mulf %70, %12 : vector<8x128xf32>
    %72 = arith.addf %71, %15 : vector<8x128xf32>
    %c112_i32_15 = arith.constant 112 : i32
    %73 = tpu.dynamic_rotate %72 by %c112_i32_15 dim 1 : vector<8x128xf32>, i32 -> vector<8x128xf32>
    %74 = arith.mulf %72, %73 : vector<8x128xf32>
    %c8_i32_16 = arith.constant 8 : i32
    %75 = tpu.dynamic_rotate %74 by %c8_i32_16 dim 1 : vector<8x128xf32>, i32 -> vector<8x128xf32>
    %76 = arith.mulf %72, %49 : vector<8x128xf32>
    %77 = arith.addf %76, %75 : vector<8x128xf32>
    %78 = math.tanh %77 : vector<8x128xf32>
    %79 = arith.mulf %73, %78 : vector<8x128xf32>
    %80 = vector.extract_strided_slice %65 {offsets = [0, 0], sizes = [8, 16], strides = [1, 1]} : vector<8x128xf32> to vector<8x16xf32>
    %cst_17 = arith.constant dense<0.000000e+00> : vector<8x128xf32>
    %81 = tpu.matmul %80, %1, %cst_17 {dimension_numbers = #tpu.dot_dimension_numbers<[1], [0], [0], [1], [0, 0, 1, 1], [], []>} : vector<8x16xf32>, vector<16x128xf32>, vector<8x128xf32> -> vector<8x128xf32>
    %82 = vector.extract_strided_slice %25 {offsets = [16, 0], sizes = [8, 128], strides = [1, 1]} : vector<64x128xf32> to vector<8x128xf32>
    %83 = arith.addf %81, %82 : vector<8x128xf32>
    %84 = math.tanh %83 : vector<8x128xf32>
    %85 = arith.mulf %84, %12 : vector<8x128xf32>
    %86 = arith.addf %85, %15 : vector<8x128xf32>
    %c112_i32_18 = arith.constant 112 : i32
    %87 = tpu.dynamic_rotate %86 by %c112_i32_18 dim 1 : vector<8x128xf32>, i32 -> vector<8x128xf32>
    %88 = arith.mulf %86, %87 : vector<8x128xf32>
    %c8_i32_19 = arith.constant 8 : i32
    %89 = tpu.dynamic_rotate %88 by %c8_i32_19 dim 1 : vector<8x128xf32>, i32 -> vector<8x128xf32>
    %90 = arith.mulf %86, %63 : vector<8x128xf32>
    %91 = arith.addf %90, %89 : vector<8x128xf32>
    %92 = math.tanh %91 : vector<8x128xf32>
    %93 = arith.mulf %87, %92 : vector<8x128xf32>
    %94 = arith.select %21, %79, %93 : vector<8x128xi1>, vector<8x128xf32>
    %95 = vector.extract_strided_slice %94 {offsets = [0, 0], sizes = [8, 48], strides = [1, 1]} : vector<8x128xf32> to vector<8x48xf32>
    %cst_20 = arith.constant dense<0.000000e+00> : vector<8x128xf32>
    %96 = tpu.matmul %95, %2, %cst_20 {dimension_numbers = #tpu.dot_dimension_numbers<[1], [0], [0], [1], [0, 0, 1, 1], [], []>} : vector<8x48xf32>, vector<48x128xf32>, vector<8x128xf32> -> vector<8x128xf32>
    %97 = arith.addf %96, %8 : vector<8x128xf32>
    %98 = math.tanh %97 : vector<8x128xf32>
    %99 = arith.mulf %98, %12 : vector<8x128xf32>
    %100 = arith.addf %99, %15 : vector<8x128xf32>
    %c112_i32_21 = arith.constant 112 : i32
    %101 = tpu.dynamic_rotate %100 by %c112_i32_21 dim 1 : vector<8x128xf32>, i32 -> vector<8x128xf32>
    %102 = arith.mulf %100, %101 : vector<8x128xf32>
    %c8_i32_22 = arith.constant 8 : i32
    %103 = tpu.dynamic_rotate %102 by %c8_i32_22 dim 1 : vector<8x128xf32>, i32 -> vector<8x128xf32>
    %104 = arith.mulf %100, %77 : vector<8x128xf32>
    %105 = arith.addf %104, %103 : vector<8x128xf32>
    %106 = math.tanh %105 : vector<8x128xf32>
    %107 = arith.mulf %101, %106 : vector<8x128xf32>
    %108 = vector.extract_strided_slice %93 {offsets = [0, 0], sizes = [8, 16], strides = [1, 1]} : vector<8x128xf32> to vector<8x16xf32>
    %cst_23 = arith.constant dense<0.000000e+00> : vector<8x128xf32>
    %109 = tpu.matmul %108, %1, %cst_23 {dimension_numbers = #tpu.dot_dimension_numbers<[1], [0], [0], [1], [0, 0, 1, 1], [], []>} : vector<8x16xf32>, vector<16x128xf32>, vector<8x128xf32> -> vector<8x128xf32>
    %110 = vector.extract_strided_slice %25 {offsets = [24, 0], sizes = [8, 128], strides = [1, 1]} : vector<64x128xf32> to vector<8x128xf32>
    %111 = arith.addf %109, %110 : vector<8x128xf32>
    %112 = math.tanh %111 : vector<8x128xf32>
    %113 = arith.mulf %112, %12 : vector<8x128xf32>
    %114 = arith.addf %113, %15 : vector<8x128xf32>
    %c112_i32_24 = arith.constant 112 : i32
    %115 = tpu.dynamic_rotate %114 by %c112_i32_24 dim 1 : vector<8x128xf32>, i32 -> vector<8x128xf32>
    %116 = arith.mulf %114, %115 : vector<8x128xf32>
    %c8_i32_25 = arith.constant 8 : i32
    %117 = tpu.dynamic_rotate %116 by %c8_i32_25 dim 1 : vector<8x128xf32>, i32 -> vector<8x128xf32>
    %118 = arith.mulf %114, %91 : vector<8x128xf32>
    %119 = arith.addf %118, %117 : vector<8x128xf32>
    %120 = math.tanh %119 : vector<8x128xf32>
    %121 = arith.mulf %115, %120 : vector<8x128xf32>
    %122 = arith.select %21, %107, %121 : vector<8x128xi1>, vector<8x128xf32>
    %123 = vector.extract_strided_slice %122 {offsets = [0, 0], sizes = [8, 48], strides = [1, 1]} : vector<8x128xf32> to vector<8x48xf32>
    %cst_26 = arith.constant dense<0.000000e+00> : vector<8x128xf32>
    %124 = tpu.matmul %123, %2, %cst_26 {dimension_numbers = #tpu.dot_dimension_numbers<[1], [0], [0], [1], [0, 0, 1, 1], [], []>} : vector<8x48xf32>, vector<48x128xf32>, vector<8x128xf32> -> vector<8x128xf32>
    %125 = arith.addf %124, %8 : vector<8x128xf32>
    %126 = math.tanh %125 : vector<8x128xf32>
    %127 = arith.mulf %126, %12 : vector<8x128xf32>
    %128 = arith.addf %127, %15 : vector<8x128xf32>
    %c112_i32_27 = arith.constant 112 : i32
    %129 = tpu.dynamic_rotate %128 by %c112_i32_27 dim 1 : vector<8x128xf32>, i32 -> vector<8x128xf32>
    %130 = arith.mulf %128, %129 : vector<8x128xf32>
    %c8_i32_28 = arith.constant 8 : i32
    %131 = tpu.dynamic_rotate %130 by %c8_i32_28 dim 1 : vector<8x128xf32>, i32 -> vector<8x128xf32>
    %132 = arith.mulf %128, %105 : vector<8x128xf32>
    %133 = arith.addf %132, %131 : vector<8x128xf32>
    %134 = math.tanh %133 : vector<8x128xf32>
    %135 = arith.mulf %129, %134 : vector<8x128xf32>
    %136 = vector.extract_strided_slice %121 {offsets = [0, 0], sizes = [8, 16], strides = [1, 1]} : vector<8x128xf32> to vector<8x16xf32>
    %cst_29 = arith.constant dense<0.000000e+00> : vector<8x128xf32>
    %137 = tpu.matmul %136, %1, %cst_29 {dimension_numbers = #tpu.dot_dimension_numbers<[1], [0], [0], [1], [0, 0, 1, 1], [], []>} : vector<8x16xf32>, vector<16x128xf32>, vector<8x128xf32> -> vector<8x128xf32>
    %138 = vector.extract_strided_slice %25 {offsets = [32, 0], sizes = [8, 128], strides = [1, 1]} : vector<64x128xf32> to vector<8x128xf32>
    %139 = arith.addf %137, %138 : vector<8x128xf32>
    %140 = math.tanh %139 : vector<8x128xf32>
    %141 = arith.mulf %140, %12 : vector<8x128xf32>
    %142 = arith.addf %141, %15 : vector<8x128xf32>
    %c112_i32_30 = arith.constant 112 : i32
    %143 = tpu.dynamic_rotate %142 by %c112_i32_30 dim 1 : vector<8x128xf32>, i32 -> vector<8x128xf32>
    %144 = arith.mulf %142, %143 : vector<8x128xf32>
    %c8_i32_31 = arith.constant 8 : i32
    %145 = tpu.dynamic_rotate %144 by %c8_i32_31 dim 1 : vector<8x128xf32>, i32 -> vector<8x128xf32>
    %146 = arith.mulf %142, %119 : vector<8x128xf32>
    %147 = arith.addf %146, %145 : vector<8x128xf32>
    %148 = math.tanh %147 : vector<8x128xf32>
    %149 = arith.mulf %143, %148 : vector<8x128xf32>
    %150 = arith.select %21, %135, %149 : vector<8x128xi1>, vector<8x128xf32>
    %151 = vector.extract_strided_slice %150 {offsets = [0, 0], sizes = [8, 48], strides = [1, 1]} : vector<8x128xf32> to vector<8x48xf32>
    %cst_32 = arith.constant dense<0.000000e+00> : vector<8x128xf32>
    %152 = tpu.matmul %151, %2, %cst_32 {dimension_numbers = #tpu.dot_dimension_numbers<[1], [0], [0], [1], [0, 0, 1, 1], [], []>} : vector<8x48xf32>, vector<48x128xf32>, vector<8x128xf32> -> vector<8x128xf32>
    %153 = arith.addf %152, %8 : vector<8x128xf32>
    %154 = math.tanh %153 : vector<8x128xf32>
    %155 = arith.mulf %154, %12 : vector<8x128xf32>
    %156 = arith.addf %155, %15 : vector<8x128xf32>
    %c112_i32_33 = arith.constant 112 : i32
    %157 = tpu.dynamic_rotate %156 by %c112_i32_33 dim 1 : vector<8x128xf32>, i32 -> vector<8x128xf32>
    %158 = arith.mulf %156, %157 : vector<8x128xf32>
    %c8_i32_34 = arith.constant 8 : i32
    %159 = tpu.dynamic_rotate %158 by %c8_i32_34 dim 1 : vector<8x128xf32>, i32 -> vector<8x128xf32>
    %160 = arith.mulf %156, %133 : vector<8x128xf32>
    %161 = arith.addf %160, %159 : vector<8x128xf32>
    %162 = math.tanh %161 : vector<8x128xf32>
    %163 = arith.mulf %157, %162 : vector<8x128xf32>
    %164 = vector.extract_strided_slice %149 {offsets = [0, 0], sizes = [8, 16], strides = [1, 1]} : vector<8x128xf32> to vector<8x16xf32>
    %cst_35 = arith.constant dense<0.000000e+00> : vector<8x128xf32>
    %165 = tpu.matmul %164, %1, %cst_35 {dimension_numbers = #tpu.dot_dimension_numbers<[1], [0], [0], [1], [0, 0, 1, 1], [], []>} : vector<8x16xf32>, vector<16x128xf32>, vector<8x128xf32> -> vector<8x128xf32>
    %166 = vector.extract_strided_slice %25 {offsets = [40, 0], sizes = [8, 128], strides = [1, 1]} : vector<64x128xf32> to vector<8x128xf32>
    %167 = arith.addf %165, %166 : vector<8x128xf32>
    %168 = math.tanh %167 : vector<8x128xf32>
    %169 = arith.mulf %168, %12 : vector<8x128xf32>
    %170 = arith.addf %169, %15 : vector<8x128xf32>
    %c112_i32_36 = arith.constant 112 : i32
    %171 = tpu.dynamic_rotate %170 by %c112_i32_36 dim 1 : vector<8x128xf32>, i32 -> vector<8x128xf32>
    %172 = arith.mulf %170, %171 : vector<8x128xf32>
    %c8_i32_37 = arith.constant 8 : i32
    %173 = tpu.dynamic_rotate %172 by %c8_i32_37 dim 1 : vector<8x128xf32>, i32 -> vector<8x128xf32>
    %174 = arith.mulf %170, %147 : vector<8x128xf32>
    %175 = arith.addf %174, %173 : vector<8x128xf32>
    %176 = math.tanh %175 : vector<8x128xf32>
    %177 = arith.mulf %171, %176 : vector<8x128xf32>
    %178 = arith.select %21, %163, %177 : vector<8x128xi1>, vector<8x128xf32>
    %179 = vector.extract_strided_slice %178 {offsets = [0, 0], sizes = [8, 48], strides = [1, 1]} : vector<8x128xf32> to vector<8x48xf32>
    %cst_38 = arith.constant dense<0.000000e+00> : vector<8x128xf32>
    %180 = tpu.matmul %179, %2, %cst_38 {dimension_numbers = #tpu.dot_dimension_numbers<[1], [0], [0], [1], [0, 0, 1, 1], [], []>} : vector<8x48xf32>, vector<48x128xf32>, vector<8x128xf32> -> vector<8x128xf32>
    %181 = arith.addf %180, %8 : vector<8x128xf32>
    %182 = math.tanh %181 : vector<8x128xf32>
    %183 = arith.mulf %182, %12 : vector<8x128xf32>
    %184 = arith.addf %183, %15 : vector<8x128xf32>
    %c112_i32_39 = arith.constant 112 : i32
    %185 = tpu.dynamic_rotate %184 by %c112_i32_39 dim 1 : vector<8x128xf32>, i32 -> vector<8x128xf32>
    %186 = arith.mulf %184, %185 : vector<8x128xf32>
    %c8_i32_40 = arith.constant 8 : i32
    %187 = tpu.dynamic_rotate %186 by %c8_i32_40 dim 1 : vector<8x128xf32>, i32 -> vector<8x128xf32>
    %188 = arith.mulf %184, %161 : vector<8x128xf32>
    %189 = arith.addf %188, %187 : vector<8x128xf32>
    %190 = math.tanh %189 : vector<8x128xf32>
    %191 = arith.mulf %185, %190 : vector<8x128xf32>
    %192 = vector.extract_strided_slice %177 {offsets = [0, 0], sizes = [8, 16], strides = [1, 1]} : vector<8x128xf32> to vector<8x16xf32>
    %cst_41 = arith.constant dense<0.000000e+00> : vector<8x128xf32>
    %193 = tpu.matmul %192, %1, %cst_41 {dimension_numbers = #tpu.dot_dimension_numbers<[1], [0], [0], [1], [0, 0, 1, 1], [], []>} : vector<8x16xf32>, vector<16x128xf32>, vector<8x128xf32> -> vector<8x128xf32>
    %194 = vector.extract_strided_slice %25 {offsets = [48, 0], sizes = [8, 128], strides = [1, 1]} : vector<64x128xf32> to vector<8x128xf32>
    %195 = arith.addf %193, %194 : vector<8x128xf32>
    %196 = math.tanh %195 : vector<8x128xf32>
    %197 = arith.mulf %196, %12 : vector<8x128xf32>
    %198 = arith.addf %197, %15 : vector<8x128xf32>
    %c112_i32_42 = arith.constant 112 : i32
    %199 = tpu.dynamic_rotate %198 by %c112_i32_42 dim 1 : vector<8x128xf32>, i32 -> vector<8x128xf32>
    %200 = arith.mulf %198, %199 : vector<8x128xf32>
    %c8_i32_43 = arith.constant 8 : i32
    %201 = tpu.dynamic_rotate %200 by %c8_i32_43 dim 1 : vector<8x128xf32>, i32 -> vector<8x128xf32>
    %202 = arith.mulf %198, %175 : vector<8x128xf32>
    %203 = arith.addf %202, %201 : vector<8x128xf32>
    %204 = math.tanh %203 : vector<8x128xf32>
    %205 = arith.mulf %199, %204 : vector<8x128xf32>
    %206 = arith.select %21, %191, %205 : vector<8x128xi1>, vector<8x128xf32>
    %207 = vector.extract_strided_slice %206 {offsets = [0, 0], sizes = [8, 48], strides = [1, 1]} : vector<8x128xf32> to vector<8x48xf32>
    %cst_44 = arith.constant dense<0.000000e+00> : vector<8x128xf32>
    %208 = tpu.matmul %207, %2, %cst_44 {dimension_numbers = #tpu.dot_dimension_numbers<[1], [0], [0], [1], [0, 0, 1, 1], [], []>} : vector<8x48xf32>, vector<48x128xf32>, vector<8x128xf32> -> vector<8x128xf32>
    %209 = arith.addf %208, %8 : vector<8x128xf32>
    %210 = math.tanh %209 : vector<8x128xf32>
    %211 = arith.mulf %210, %12 : vector<8x128xf32>
    %212 = arith.addf %211, %15 : vector<8x128xf32>
    %c112_i32_45 = arith.constant 112 : i32
    %213 = tpu.dynamic_rotate %212 by %c112_i32_45 dim 1 : vector<8x128xf32>, i32 -> vector<8x128xf32>
    %214 = arith.mulf %212, %213 : vector<8x128xf32>
    %c8_i32_46 = arith.constant 8 : i32
    %215 = tpu.dynamic_rotate %214 by %c8_i32_46 dim 1 : vector<8x128xf32>, i32 -> vector<8x128xf32>
    %216 = arith.mulf %212, %189 : vector<8x128xf32>
    %217 = arith.addf %216, %215 : vector<8x128xf32>
    %218 = math.tanh %217 : vector<8x128xf32>
    %219 = arith.mulf %213, %218 : vector<8x128xf32>
    %220 = vector.extract_strided_slice %205 {offsets = [0, 0], sizes = [8, 16], strides = [1, 1]} : vector<8x128xf32> to vector<8x16xf32>
    %cst_47 = arith.constant dense<0.000000e+00> : vector<8x128xf32>
    %221 = tpu.matmul %220, %1, %cst_47 {dimension_numbers = #tpu.dot_dimension_numbers<[1], [0], [0], [1], [0, 0, 1, 1], [], []>} : vector<8x16xf32>, vector<16x128xf32>, vector<8x128xf32> -> vector<8x128xf32>
    %222 = vector.extract_strided_slice %25 {offsets = [56, 0], sizes = [8, 128], strides = [1, 1]} : vector<64x128xf32> to vector<8x128xf32>
    %223 = arith.addf %221, %222 : vector<8x128xf32>
    %224 = math.tanh %223 : vector<8x128xf32>
    %225 = arith.mulf %224, %12 : vector<8x128xf32>
    %226 = arith.addf %225, %15 : vector<8x128xf32>
    %c112_i32_48 = arith.constant 112 : i32
    %227 = tpu.dynamic_rotate %226 by %c112_i32_48 dim 1 : vector<8x128xf32>, i32 -> vector<8x128xf32>
    %228 = arith.mulf %226, %227 : vector<8x128xf32>
    %c8_i32_49 = arith.constant 8 : i32
    %229 = tpu.dynamic_rotate %228 by %c8_i32_49 dim 1 : vector<8x128xf32>, i32 -> vector<8x128xf32>
    %230 = arith.mulf %226, %203 : vector<8x128xf32>
    %231 = arith.addf %230, %229 : vector<8x128xf32>
    %232 = math.tanh %231 : vector<8x128xf32>
    %233 = arith.mulf %227, %232 : vector<8x128xf32>
    %234 = arith.select %21, %219, %233 : vector<8x128xi1>, vector<8x128xf32>
    %235 = vector.extract_strided_slice %234 {offsets = [0, 0], sizes = [8, 48], strides = [1, 1]} : vector<8x128xf32> to vector<8x48xf32>
    %cst_50 = arith.constant dense<0.000000e+00> : vector<8x128xf32>
    %236 = tpu.matmul %235, %2, %cst_50 {dimension_numbers = #tpu.dot_dimension_numbers<[1], [0], [0], [1], [0, 0, 1, 1], [], []>} : vector<8x48xf32>, vector<48x128xf32>, vector<8x128xf32> -> vector<8x128xf32>
    %237 = arith.addf %236, %8 : vector<8x128xf32>
    %238 = math.tanh %237 : vector<8x128xf32>
    %239 = arith.mulf %238, %12 : vector<8x128xf32>
    %240 = arith.addf %239, %15 : vector<8x128xf32>
    %c112_i32_51 = arith.constant 112 : i32
    %241 = tpu.dynamic_rotate %240 by %c112_i32_51 dim 1 : vector<8x128xf32>, i32 -> vector<8x128xf32>
    %242 = arith.mulf %240, %241 : vector<8x128xf32>
    %c8_i32_52 = arith.constant 8 : i32
    %243 = tpu.dynamic_rotate %242 by %c8_i32_52 dim 1 : vector<8x128xf32>, i32 -> vector<8x128xf32>
    %244 = arith.mulf %240, %217 : vector<8x128xf32>
    %245 = arith.addf %244, %243 : vector<8x128xf32>
    %246 = math.tanh %245 : vector<8x128xf32>
    %247 = arith.mulf %241, %246 : vector<8x128xf32>
    %248 = vector.extract_strided_slice %247 {offsets = [0, 0], sizes = [8, 48], strides = [1, 1]} : vector<8x128xf32> to vector<8x48xf32>
    %cst_53 = arith.constant dense<0.000000e+00> : vector<8x128xf32>
    %249 = tpu.matmul %248, %3, %cst_53 {dimension_numbers = #tpu.dot_dimension_numbers<[1], [0], [0], [1], [0, 0, 1, 1], [], []>} : vector<8x48xf32>, vector<48x128xf32>, vector<8x128xf32> -> vector<8x128xf32>
    %250 = vector.broadcast %9 : vector<1x128xf32> to vector<8x128xf32>
    %251 = arith.addf %249, %250 : vector<8x128xf32>
    %c0_54 = arith.constant 0 : index
    %c0_55 = arith.constant 0 : index
    %252 = vector.load %arg2[%c0_54, %c0_55] : memref<8x128xf32, #tpu.memory_space<vmem>>, vector<8x128xf32>
    tpu.vector_store %arg2[%c0_54, %c0_55], %251 {strides = array<i32>} : memref<8x128xf32, #tpu.memory_space<vmem>>, vector<8x128xf32>,
    return
  }
}

</mosaic_0001>

<bundles_post_ra>
// kernel: tpu_custom_call.1
= control target key start
LH: loop header
LB: loop body
LE: loop exit
PB: predicated region body
PF: predicated region fallthrough
CT: control target
= control target key end

     0   :  { %7 = vsyncpa [#allocation3], 0  ;;  %s2468_s0 = inlined_call_operand.vmem [shape: f32[64,8], index: 0, kind: input, shape index: {}]   ;;  %s2469_s1 = inlined_call_operand.hbm [shape: f32[128,128], index: 1, kind: input, shape index: {}]   ;;  %s2470_s2 = inlined_call_operand.hbm [shape: f32[8,128], index: 2, kind: output, shape index: {}]  }
   0x1   :  { %8 = vsyncpa [#allocation4], 0  ;;  %s2130_s9 = smov [#allocation2]   ;;  %s2082_s13 = scalar_lea.hbm %s2469_s1, 2048 }
   0x2   :  { %s16_s10 = sshll.u32 %s2130_s9, 4  ;;  %p2083_p0 = scmp.ne.s32.totalorder %s2469_s1, %s2082_s13  ;;  %s17_s10 = int_to_ptr.vmem [resolvable:$true] %s16_s10 }
   0x3   :  { %p2086_p1 = scmp.lt.u32.totalorder %s2082_s13, %s2469_s1 }
   0x5   :  { %p2088_p2 = pnand %p2086_p1, %p2083_p0 }
   0x7   :  { %2091 = shalt.err (!%p2088_p2)
}
   0x8   :  { %s2092_s18 = scalar_lea.vmem %s17_s10, 2048  ;;  %p2097_p4 = scmp.lt.s32.totalorder %s17_s10, %s17_s10 }
   0x9   :  { %p2093_p3 = scmp.ne.s32.totalorder %s17_s10, %s2092_s18  ;;  %p2098_p5 = scmp.lt.s32.totalorder %s2092_s18, %s2092_s18 }
   0xb   :  { %p2099_p6 = por %p2098_p5, %p2097_p4 }
   0xd   :  { %p2100_p7 = pnand %p2099_p6, %p2093_p3 }
   0xf   :  { %2103 = shalt.err (!%p2100_p7)
}
  0x10   :  { %s2131_s19 = smov 128   ;;  %s2132_s20 = smov 8  }
  0x11   :  { %22 = dma.hbm_to_vmem [thread:$0]  %s2469_s1, 2048, %s17_s10, [#allocation3], %s2131_s19, %s2131_s19, %s2132_s20  }
  0x12   :  { %2126 = dma.done.wait [#allocation3], 2048  }
  0x13   :  { %2127 = vsyncadd [#allocation3], 4294965248  ;;  %vm71_vm0 = vcmask 64512   ;;  %v26_v0 = vld [vmem:[#allocation2] sm:$0xff]  ;;  %v60_v2 = vld [vmem:[%s2468_s0 + $0x8] sm:$0xff]  ;;  %v42_v3 = vlaneseq  ;;  %s2133_s1 = smov 112  }
  0x14   :  { %v59_v1 = vld [vmem:[%s2468_s0] sm:$0xff]  ;;  %1708 = vmatprep.subr.mxu0 %v26_v0  ;;  %2008 = vmatprep.subr.mxu1 %v26_v0  ;;  %v2177_v6 = vld [vmem:[#allocation2 + $0x78] sm:$0xff]  ;;  %v65_v18 = vld [vmem:[%s2468_s0 + $0x30] sm:$0xff]  ;;  %v2134_v21 = vmov 0.0|0.0   ;;  %vm2135_vm1 = vmmov 0   ;;  %v2136_v26 = vmov 0.0  }
  0x15   :  { %1710 = vmatprep.mubr.msk.f32.mxu0 %vm71_vm0, %v59_v1  ;;  %1709 = vmatpush3.msra.mxu0 %v26_v0  ;;  %v2174_v4 = vshrl.u32 %v42_v3, 7  ;;  %v66_v19 = vld [vmem:[%s2468_s0 + $0x38] sm:$0xff]  ;;  %v30_v22 = vld [vmem:[#allocation2 + $0x20] sm:$0xff]  ;;  %v31_v23 = vld [vmem:[#allocation2 + $0x28] sm:$0xff]  ;;  %v55_v36 = vand.u32 127, %v42_v3  ;;  %vm214_vm5 = vcmask 392192  }
  0x16   :  { %1711 = vmatmul.mubr.msk.f32.vlgmr.msra.gmra.mrb[0].mxu0 %vm71_vm0, %v60_v2  ;;  %2009 = vmatpush3.msra.mxu1 %v26_v0  ;;  %v29_v20 = vld [vmem:[#allocation2 + $0x18] sm:$0xff]  ;;  %v32_v24 = vld [vmem:[#allocation2 + $0x30] sm:$0xff]  ;;  %v34_v29 = vld [vmem:[#allocation2 + $0x40] sm:$0xff]  ;;  %vm300_vm6 = vcmask 130048  }
  0x17   :  { %v69_v5 = vsub.s32 0, %v2174_v4  ;;  %v48_v11 = vsub.s32 3, %v2174_v4  ;;  %v52_v12 = vsub.s32 4, %v2174_v4  ;;  %1719 = vmatprep.mubr.msk.f32.mxu1 %vm71_vm0, %v65_v18  ;;  %1906 = vmatprep.subr.bf16.mxu1 %v2134_v21  ;;  %v2205_v25 = vpack.c.bf16 %v30_v22, %v29_v20  ;;  %v33_v28 = vld [vmem:[#allocation2 + $0x38] sm:$0xff]  ;;  %v27_v37 = vld [vmem:[#allocation2 + $0x8] sm:$0xff]  ;;  %v28_v38 = vld [vmem:[#allocation2 + $0x10] sm:$0xff] }
  0x18   :  { %1720 = vmatmul.mubr.msk.f32.vlgmr.msra.gmra.mrb[0].mxu1 %vm71_vm0, %v66_v19  ;;  %1918 = vmatprep.subr.bf16.mxu0 %v2134_v21  ;;  %v2211_v27 = vpack.c.bf16 %v32_v24, %v31_v23  ;;  %v2217_v31 = vpack.c.bf16 %v34_v29, %v33_v28  ;;  %vm56_vm2 = vcmp.ge.s32.totalorder %v55_v36, 40  ;;  %vm57_vm3 = vcmp.lt.s32.totalorder %v55_v36, 48  ;;  %v61_v61 = vld [vmem:[%s2468_s0 + $0x10] sm:$0xff]  ;;  %v62_v62 = vld [vmem:[%s2468_s0 + $0x18] sm:$0xff]  ;;  %v63_v63 = vld [vmem:[%s2468_s0 + $0x20] sm:$0xff] }
  0x19   :  { %v2180_v7 = vrot.slane %v2177_v6, %v69_v5  ;;  %v2188_v13 = vrot.slane %v2177_v6, %v48_v11  ;;  %v2191_v14 = vrot.slane %v2177_v6, %v52_v12  ;;  %1734 = vmatprep.mubr.msk.f32.mxu1 %vm2135_vm1, %v2136_v26  ;;  %1908 = vmatpush3.bf16.msra.mxu1 %v2205_v25  ;;  %vm2227_vm4 = vmand %vm56_vm2, %vm57_vm3  ;;  %v44_v46 = vsub.s32 1, %v2174_v4  ;;  %v64_v0 = vld [vmem:[%s2468_s0 + $0x28] sm:$0xff]  ;;  %v38_v40 = vld [vmem:[#allocation2 + $0x60] sm:$0xff]  ;;  %s2137_s0 = smov [#allocation5]  }
  0x1a   :  { %1920 = vmatpush3.bf16.msra.mxu0 %v2205_v25  ;;  %1909 = vmatprep.subr.bf16.mxu1 %v2134_v21  ;;  %v2231_v42 = vpack.c.bf16 %v28_v38, %v27_v37  ;;  %s1582_s11 = sshll.u32 %s2137_s0, 4  ;;  %s1583_s11 = int_to_ptr.vmem [resolvable:$true] %s1582_s11 }
  0x1b   :  { %1921 = vmatprep.subr.bf16.mxu0 %v2134_v21  ;;  %v2251_v47 = vrot.slane %v2177_v6, %v44_v46  ;;  %1713 = vmatprep.mubr.msk.f32.mxu0 %vm71_vm0, %v61_v61  ;;  %s2104_s12 = scalar_lea.vmem %s1583_s11, 128  ;;  %p2109_p9 = scmp.lt.s32.totalorder %s1583_s11, %s1583_s11 }
  0x1c   :  { %1714 = vmatmul.mubr.msk.f32.gmra.mrb[2].mxu0 %vm71_vm0, %v62_v62  ;;  %p2105_p8 = scmp.ne.s32.totalorder %s1583_s11, %s2104_s12  ;;  %p2110_p10 = scmp.lt.s32.totalorder %s2104_s12, %s2104_s12 }
  0x1d   :  { %1911 = vmatpush3.bf16.msra.mxu1 %v2211_v27  ;;  %1716 = vmatprep.mubr.msk.f32.mxu0 %vm71_vm0, %v63_v63 }
  0x1e   :  { %1923 = vmatpush3.bf16.msra.mxu0 %v2211_v27  ;;  %1912 = vmatprep.subr.bf16.mxu1 %v2134_v21  ;;  %p2111_p11 = por %p2110_p10, %p2109_p9 }
  0x1f   :  { %1924 = vmatprep.subr.bf16.mxu0 %v2134_v21 }
  0x20   :  { %1717 = vmatmul.mubr.msk.f32.gmra.mrb[4].mxu0 %vm71_vm0, %v64_v0  ;;  %p2112_p12 = pnand %p2111_p11, %p2105_p8 }
  0x21   :  { %1914 = vmatpush3.bf16.msra.mxu1 %v2217_v31  ;;  %1756 = vmatprep.mubr.msk.f32.mxu0 %vm2135_vm1, %v2136_v26 }
  0x22   :  { %1926 = vmatpush3.bf16.msra.mxu0 %v2217_v31  ;;  %1915 = vmatprep.subr.bf16.mxu1 %v2134_v21 }
  0x23   :  { %1930 = vmatprep.subr.bf16.mxu0 %v2134_v21 }
  0xe9   :  { %v2182_v8 = vpop.f32.mrb[0].mxu0 }
  0xea   :  { %v162_v9 = vpop.f32.mrb[1].mxu0  ;;  %v168_v51 = vadd.f32 %v2182_v8, %v2180_v7 }
  0xeb   :  { %v163_v10 = vadd.f32 %v162_v9, %v2180_v7  ;;  %v2245_v44 = vpop.f32.mrb[0].mxu1 }
  0xec   :  { %v2247_v45 = vpop.f32.mrb[1].mxu1 }
  0xed   :  { %2018 = vtanh.f32 %v163_v10 }
  0xef   :  { %v1715_v22 = vpop.f32.mrb[2].mxu0 }
  0xf0   :  { %v172_v23 = vpop.f32.mrb[3].mxu0  ;;  %v178_v63 = vadd.f32 %v1715_v22, %v2180_v7 }
  0xf1   :  { %v173_v29 = vadd.f32 %v172_v23, %v2180_v7 }
  0xf3   :  { %v2298_v24 = vpop.f32.mrb[4].mxu0 }
  0xf4   :  { %v2300_v28 = vpop.f32.mrb[5].mxu0 }
  0xf7   :  { %v2019_v15 = vpop.eup %2018 }
  0xf8   :  { %v202_v16 = vmul.f32 %v2019_v15, %v2188_v13 }
  0xfa   :  { %v203_v17 = vadd.f32 %v202_v16, %v2191_v14 }
  0xfc   :  { %204 = vrot.lane.b32.xlu0 %v203_v17, %s2133_s1  ;;  %v209_v33 = vmul.f32 0.0, %v203_v17 }
 0x16e   :  { %v205_v30 = vpop.permute.xlu0 %204 }
 0x16f   :  { %v206_v32 = vmul.f32 %v205_v30, %v203_v17 }
 0x171   :  { %207 = vrot.lane.b32.xlu0 %v206_v32, %s2132_s20 }
 0x1e3   :  { %v208_v34 = vpop.permute.xlu0 %207 }
 0x1e4   :  { %v210_v35 = vadd.f32 %v209_v33, %v208_v34 }
 0x1e6   :  { %2020 = vtanh.f32 %v210_v35 }
 0x1f0   :  { %v2021_v39 = vpop.eup %2020 }
 0x1f1   :  { %v212_v41 = vmul.f32 %v2021_v39, %v205_v30 }
 0x1f3   :  { %v213_v43 = vsel %vm2227_vm4, 0.0, %v212_v41 }
 0x1f4   :  { %1735 = vmatmul.mubr.msk.f32.vlgmr.msra.gmra.mrb[2].mxu1 %vm214_vm5, %v213_v43 }
 0x1f5   :  { %1917 = vmatpush3.bf16.msra.mxu1 %v2231_v42  ;;  %1741 = vmatprep.mubr.msk.f32.mxu1 %vm2135_vm1, %v2136_v26 }
 0x1f6   :  { %1927 = vmatprep.subr.bf16.mxu1 %v2134_v21 }
 0x1f8   :  { %1742 = vmatmul.mubr.msk.f32.vlgmr.msra.gmra.mrb[4].mxu1 %vm300_vm6, %v212_v41 }
 0x1f9   :  { %1929 = vmatpush3.bf16.msra.mxu1 %v2231_v42  ;;  %1763 = vmatprep.mubr.msk.f32.mxu1 %vm2135_vm1, %v2136_v26 }
 0x1fa   :  { %1939 = vmatprep.subr.bf16.mxu1 %v2134_v21 }
 0x2c7   :  { %v284_v48 = vpop.f32.mrb[2].mxu1 }
 0x2c8   :  { %v285_v49 = vadd.f32 %v284_v48, %v2251_v47  ;;  %v1736_v50 = vpop.f32.mrb[3].mxu1 }
 0x2ca   :  { %2022 = vtanh.f32 %v285_v49 }
 0x2cb   :  { %v370_v52 = vpop.f32.mrb[4].mxu1 }
 0x2cc   :  { %v371_v53 = vadd.f32 %v370_v52, %v168_v51  ;;  %v1743_v54 = vpop.f32.mrb[5].mxu1 }
 0x2ce   :  { %2024 = vtanh.f32 %v371_v53 }
 0x2d4   :  { %v2023_v55 = vpop.eup %2022 }
 0x2d5   :  { %v289_v56 = vmul.f32 %v2023_v55, %v2188_v13 }
 0x2d7   :  { %v290_v57 = vadd.f32 %v289_v56, %v2191_v14 }
 0x2d8   :  { %v2025_v58 = vpop.eup %2024 }
 0x2d9   :  { %291 = vrot.lane.b32.xlu1 %v290_v57, %s2133_s1  ;;  %v375_v59 = vmul.f32 %v2025_v58, %v2188_v13  ;;  %v296_v8 = vmul.f32 0.0, %v290_v57 }
 0x2db   :  { %v376_v60 = vadd.f32 %v375_v59, %v2191_v14 }
 0x2dd   :  { %377 = vrot.lane.b32.xlu1 %v376_v60, %s2133_s1  ;;  %v382_v11 = vmul.f32 %v376_v60, %v210_v35 }
 0x34b   :  { %v292_v1 = vpop.permute.xlu1 %291 }
 0x34c   :  { %v293_v2 = vmul.f32 %v292_v1, %v290_v57 }
 0x34e   :  { %294 = vrot.lane.b32.xlu0 %v293_v2, %s2132_s20 }
 0x34f   :  { %v378_v3 = vpop.permute.xlu1 %377 }
 0x350   :  { %v379_v5 = vmul.f32 %v378_v3, %v376_v60 }
 0x352   :  { %380 = vrot.lane.b32.xlu1 %v379_v5, %s2132_s20 }
 0x3c0   :  { %v295_v9 = vpop.permute.xlu0 %294 }
 0x3c1   :  { %v297_v10 = vadd.f32 %v296_v8, %v295_v9 }
 0x3c3   :  { %2026 = vtanh.f32 %v297_v10 }
 0x3c4   :  { %v381_v12 = vpop.permute.xlu1 %380 }
 0x3c5   :  { %v383_v15 = vadd.f32 %v382_v11, %v381_v12 }
 0x3c7   :  { %2028 = vtanh.f32 %v383_v15 }
 0x3cd   :  { %v2027_v16 = vpop.eup %2026 }
 0x3ce   :  { %v299_v19 = vmul.f32 %v2027_v16, %v292_v1 }
 0x3d1   :  { %v2029_v17 = vpop.eup %2028 }
 0x3d2   :  { %v385_v18 = vmul.f32 %v2029_v17, %v378_v3 }
 0x3d4   :  { %1764 = vmatmul.mubr.msk.f32.vlgmr.msra.gmra.mrb[6].mxu1 %vm300_vm6, %v385_v18  ;;  %v386_v20 = vsel %vm2227_vm4, %v299_v19, %v385_v18 }
 0x3d5   :  { %1757 = vmatmul.mubr.msk.f32.vlgmr.msra.gmra.mrb[6].mxu0 %vm214_vm5, %v386_v20  ;;  %1941 = vmatpush3.bf16.msra.mxu1 %v2231_v42 }
 0x3d6   :  { %1932 = vmatpush3.bf16.msra.mxu0 %v2205_v25  ;;  %1785 = vmatprep.mubr.msk.f32.mxu1 %vm2135_vm1, %v2136_v26 }
 0x3d7   :  { %1933 = vmatprep.subr.bf16.mxu0 %v2134_v21  ;;  %1778 = vmatprep.mubr.msk.f32.mxu0 %vm2135_vm1, %v2136_v26 }
 0x3d8   :  { %1942 = vmatprep.subr.bf16.mxu1 %v2134_v21 }
 0x3da   :  { %1935 = vmatpush3.bf16.msra.mxu0 %v2211_v27 }
 0x3db   :  { %1936 = vmatprep.subr.bf16.mxu0 %v2134_v21 }
 0x3de   :  { %1938 = vmatpush3.bf16.msra.mxu0 %v2217_v31 }
 0x3df   :  { %1951 = vmatprep.subr.bf16.mxu0 %v2134_v21 }
 0x4a7   :  { %v541_v30 = vpop.f32.mrb[6].mxu1 }
 0x4a8   :  { %v542_v32 = vadd.f32 %v541_v30, %v173_v29  ;;  %v456_v33 = vpop.f32.mrb[6].mxu0  ;;  %v1765_v34 = vpop.f32.mrb[7].mxu1 }
 0x4a9   :  { %v457_v35 = vadd.f32 %v456_v33, %v2251_v47  ;;  %v1758_v36 = vpop.f32.mrb[7].mxu0 }
 0x4aa   :  { %2030 = vtanh.f32 %v542_v32 }
 0x4ab   :  { %2032 = vtanh.f32 %v457_v35 }
 0x4b4   :  { %v2031_v37 = vpop.eup %2030 }
 0x4b5   :  { %v2033_v38 = vpop.eup %2032  ;;  %v546_v39 = vmul.f32 %v2031_v37, %v2188_v13 }
 0x4b6   :  { %v461_v41 = vmul.f32 %v2033_v38, %v2188_v13 }
 0x4b7   :  { %v547_v43 = vadd.f32 %v546_v39, %v2191_v14  ;;  %v183_v39 = vadd.f32 %v2300_v28, %v2180_v7 }
 0x4b8   :  { %v462_v46 = vadd.f32 %v461_v41, %v2191_v14 }
 0x4b9   :  { %548 = vrot.lane.b32.xlu1 %v547_v43, %s2133_s1  ;;  %v553_v52 = vmul.f32 %v547_v43, %v383_v15 }
 0x4ba   :  { %463 = vrot.lane.b32.xlu0 %v462_v46, %s2133_s1  ;;  %v468_v54 = vmul.f32 %v462_v46, %v297_v10 }
 0x52b   :  { %v549_v48 = vpop.permute.xlu1 %548 }
 0x52c   :  { %v464_v49 = vpop.permute.xlu0 %463  ;;  %v550_v50 = vmul.f32 %v549_v48, %v547_v43 }
 0x52d   :  { %v465_v51 = vmul.f32 %v464_v49, %v462_v46 }
 0x52e   :  { %551 = vrot.lane.b32.xlu1 %v550_v50, %s2132_s20 }
 0x52f   :  { %466 = vrot.lane.b32.xlu0 %v465_v51, %s2132_s20 }
 0x5a0   :  { %v552_v53 = vpop.permute.xlu1 %551 }
 0x5a1   :  { %v554_v55 = vadd.f32 %v553_v52, %v552_v53  ;;  %v467_v56 = vpop.permute.xlu0 %466 }
 0x5a2   :  { %v469_v57 = vadd.f32 %v468_v54, %v467_v56 }
 0x5a3   :  { %2034 = vtanh.f32 %v554_v55 }
 0x5a4   :  { %2036 = vtanh.f32 %v469_v57 }
 0x5ad   :  { %v2035_v58 = vpop.eup %2034 }
 0x5ae   :  { %v2037_v59 = vpop.eup %2036  ;;  %v556_v60 = vmul.f32 %v2035_v58, %v549_v48 }
 0x5af   :  { %v471_v61 = vmul.f32 %v2037_v59, %v464_v49 }
 0x5b0   :  { %1786 = vmatmul.mubr.msk.f32.vlgmr.msra.gmra.mrb[8].mxu1 %vm300_vm6, %v556_v60 }
 0x5b1   :  { %v557_v62 = vsel %vm2227_vm4, %v471_v61, %v556_v60  ;;  %1944 = vmatpush3.bf16.msra.mxu1 %v2205_v25  ;;  %1800 = vmatprep.mubr.msk.f32.mxu1 %vm2135_vm1, %v2136_v26 }
 0x5b2   :  { %1779 = vmatmul.mubr.msk.f32.vlgmr.msra.gmra.mrb[8].mxu0 %vm214_vm5, %v557_v62  ;;  %1945 = vmatprep.subr.bf16.mxu1 %v2134_v21 }
 0x5b3   :  { %1953 = vmatpush3.bf16.msra.mxu0 %v2231_v42  ;;  %1807 = vmatprep.mubr.msk.f32.mxu0 %vm2135_vm1, %v2136_v26 }
 0x5b4   :  { %1954 = vmatprep.subr.bf16.mxu0 %v2134_v21 }
 0x5b5   :  { %1947 = vmatpush3.bf16.msra.mxu1 %v2211_v27 }
 0x5b6   :  { %1948 = vmatprep.subr.bf16.mxu1 %v2134_v21 }
 0x5b9   :  { %1950 = vmatpush3.bf16.msra.mxu1 %v2217_v31 }
 0x5ba   :  { %1963 = vmatprep.subr.bf16.mxu1 %v2134_v21 }
 0x683   :  { %v712_v0 = vpop.f32.mrb[8].mxu1 }
 0x684   :  { %v713_v1 = vadd.f32 %v712_v0, %v178_v63  ;;  %v1787_v2 = vpop.f32.mrb[9].mxu1 }
 0x685   :  { %v627_v3 = vpop.f32.mrb[8].mxu0 }
 0x686   :  { %2038 = vtanh.f32 %v713_v1  ;;  %v628_v5 = vadd.f32 %v627_v3, %v2251_v47  ;;  %v1780_v8 = vpop.f32.mrb[9].mxu0 }
 0x688   :  { %2040 = vtanh.f32 %v628_v5 }
 0x690   :  { %v2039_v9 = vpop.eup %2038 }
 0x691   :  { %v717_v10 = vmul.f32 %v2039_v9, %v2188_v13 }
 0x692   :  { %v2041_v11 = vpop.eup %2040 }
 0x693   :  { %v718_v12 = vadd.f32 %v717_v10, %v2191_v14  ;;  %v632_v15 = vmul.f32 %v2041_v11, %v2188_v13  ;;  %v188_v10 = vadd.f32 %v2298_v24, %v2180_v7 }
 0x695   :  { %719 = vrot.lane.b32.xlu1 %v718_v12, %s2133_s1  ;;  %v633_v16 = vadd.f32 %v632_v15, %v2191_v14  ;;  %v724_v22 = vmul.f32 %v718_v12, %v554_v55 }
 0x697   :  { %634 = vrot.lane.b32.xlu0 %v633_v16, %s2133_s1  ;;  %v639_v30 = vmul.f32 %v633_v16, %v469_v57 }
 0x707   :  { %v720_v17 = vpop.permute.xlu1 %719 }
 0x708   :  { %v721_v18 = vmul.f32 %v720_v17, %v718_v12 }
 0x709   :  { %v635_v19 = vpop.permute.xlu0 %634 }
 0x70a   :  { %722 = vrot.lane.b32.xlu1 %v721_v18, %s2132_s20  ;;  %v636_v20 = vmul.f32 %v635_v19, %v633_v16 }
 0x70c   :  { %637 = vrot.lane.b32.xlu0 %v636_v20, %s2132_s20 }
 0x77c   :  { %v723_v23 = vpop.permute.xlu1 %722 }
 0x77d   :  { %v725_v29 = vadd.f32 %v724_v22, %v723_v23 }
 0x77e   :  { %v638_v32 = vpop.permute.xlu0 %637 }
 0x77f   :  { %2042 = vtanh.f32 %v725_v29  ;;  %v640_v33 = vadd.f32 %v639_v30, %v638_v32 }
 0x781   :  { %2044 = vtanh.f32 %v640_v33 }
 0x789   :  { %v2043_v34 = vpop.eup %2042 }
 0x78a   :  { %v727_v35 = vmul.f32 %v2043_v34, %v720_v17 }
 0x78b   :  { %v2045_v36 = vpop.eup %2044 }
 0x78c   :  { %1808 = vmatmul.mubr.msk.f32.vlgmr.msra.gmra.mrb[10].mxu0 %vm300_vm6, %v727_v35  ;;  %v642_v37 = vmul.f32 %v2045_v36, %v635_v19 }
 0x78d   :  { %1956 = vmatpush3.bf16.msra.mxu0 %v2205_v25  ;;  %1822 = vmatprep.mubr.msk.f32.mxu0 %vm2135_vm1, %v2136_v26 }
 0x78e   :  { %v728_v38 = vsel %vm2227_vm4, %v642_v37, %v727_v35  ;;  %1957 = vmatprep.subr.bf16.mxu0 %v2134_v21 }
 0x78f   :  { %1801 = vmatmul.mubr.msk.f32.vlgmr.msra.gmra.mrb[10].mxu1 %vm214_vm5, %v728_v38 }
 0x790   :  { %1965 = vmatpush3.bf16.msra.mxu1 %v2231_v42  ;;  %1829 = vmatprep.mubr.msk.f32.mxu1 %vm2135_vm1, %v2136_v26 }
 0x791   :  { %1959 = vmatpush3.bf16.msra.mxu0 %v2211_v27  ;;  %1966 = vmatprep.subr.bf16.mxu1 %v2134_v21 }
 0x792   :  { %1960 = vmatprep.subr.bf16.mxu0 %v2134_v21 }
 0x795   :  { %1962 = vmatpush3.bf16.msra.mxu0 %v2217_v31 }
 0x796   :  { %1975 = vmatprep.subr.bf16.mxu0 %v2134_v21 }
 0x85f   :  { %v883_v41 = vpop.f32.mrb[10].mxu0 }
 0x860   :  { %v884_v43 = vadd.f32 %v883_v41, %v183_v39  ;;  %v1809_v46 = vpop.f32.mrb[11].mxu0 }
 0x862   :  { %2046 = vtanh.f32 %v884_v43  ;;  %v798_v48 = vpop.f32.mrb[10].mxu1 }
 0x863   :  { %v799_v49 = vadd.f32 %v798_v48, %v2251_v47  ;;  %v1802_v50 = vpop.f32.mrb[11].mxu1 }
 0x865   :  { %2048 = vtanh.f32 %v799_v49 }
 0x86c   :  { %v2047_v51 = vpop.eup %2046 }
 0x86d   :  { %v888_v52 = vmul.f32 %v2047_v51, %v2188_v13  ;;  %v193_v51 = vadd.f32 %v2247_v45, %v2180_v7 }
 0x86f   :  { %v2049_v53 = vpop.eup %2048  ;;  %v889_v54 = vadd.f32 %v888_v52, %v2191_v14 }
 0x870   :  { %v803_v55 = vmul.f32 %v2049_v53, %v2188_v13 }
 0x871   :  { %890 = vrot.lane.b32.xlu1 %v889_v54, %s2133_s1  ;;  %v895_v60 = vmul.f32 %v889_v54, %v725_v29 }
 0x872   :  { %v804_v28 = vadd.f32 %v803_v55, %v2191_v14 }
 0x874   :  { %805 = vrot.lane.b32.xlu0 %v804_v28, %s2133_s1  ;;  %v810_v63 = vmul.f32 %v804_v28, %v640_v33 }
 0x8e3   :  { %v891_v56 = vpop.permute.xlu1 %890 }
 0x8e4   :  { %v892_v57 = vmul.f32 %v891_v56, %v889_v54 }
 0x8e6   :  { %893 = vrot.lane.b32.xlu1 %v892_v57, %s2132_s20  ;;  %v806_v58 = vpop.permute.xlu0 %805 }
 0x8e7   :  { %v807_v59 = vmul.f32 %v806_v58, %v804_v28 }
 0x8e9   :  { %808 = vrot.lane.b32.xlu0 %v807_v59, %s2132_s20 }
 0x958   :  { %v894_v61 = vpop.permute.xlu1 %893 }
 0x959   :  { %v896_v62 = vadd.f32 %v895_v60, %v894_v61 }
 0x95b   :  { %2050 = vtanh.f32 %v896_v62  ;;  %v809_v0 = vpop.permute.xlu0 %808 }
 0x95c   :  { %v811_v1 = vadd.f32 %v810_v63, %v809_v0 }
 0x95e   :  { %2052 = vtanh.f32 %v811_v1 }
 0x965   :  { %v2051_v2 = vpop.eup %2050 }
 0x966   :  { %v898_v3 = vmul.f32 %v2051_v2, %v891_v56 }
 0x968   :  { %v2053_v5 = vpop.eup %2052  ;;  %1830 = vmatmul.mubr.msk.f32.vlgmr.msra.gmra.mrb[12].mxu1 %vm300_vm6, %v898_v3 }
 0x969   :  { %v813_v8 = vmul.f32 %v2053_v5, %v806_v58  ;;  %1968 = vmatpush3.bf16.msra.mxu1 %v2205_v25  ;;  %1844 = vmatprep.mubr.msk.f32.mxu1 %vm2135_vm1, %v2136_v26 }
 0x96a   :  { %1969 = vmatprep.subr.bf16.mxu1 %v2134_v21 }
 0x96b   :  { %v899_v9 = vsel %vm2227_vm4, %v813_v8, %v898_v3 }
 0x96c   :  { %1823 = vmatmul.mubr.msk.f32.vlgmr.msra.gmra.mrb[12].mxu0 %vm214_vm5, %v899_v9 }
 0x96d   :  { %1977 = vmatpush3.bf16.msra.mxu0 %v2231_v42  ;;  %1971 = vmatpush3.bf16.msra.mxu1 %v2211_v27 }
 0x96e   :  { %1851 = vmatprep.mubr.msk.f32.mxu0 %vm2135_vm1, %v2136_v26  ;;  %1972 = vmatprep.subr.bf16.mxu1 %v2134_v21 }
 0x96f   :  { %1978 = vmatprep.subr.bf16.mxu0 %v2134_v21 }
 0x971   :  { %1974 = vmatpush3.bf16.msra.mxu1 %v2217_v31 }
 0x972   :  { %1987 = vmatprep.subr.bf16.mxu1 %v2134_v21 }
 0xa3b   :  { %v1054_v11 = vpop.f32.mrb[12].mxu1 }
 0xa3c   :  { %v1055_v12 = vadd.f32 %v1054_v11, %v188_v10  ;;  %v1831_v15 = vpop.f32.mrb[13].mxu1 }
 0xa3e   :  { %2054 = vtanh.f32 %v1055_v12 }
 0xa3f   :  { %v969_v16 = vpop.f32.mrb[12].mxu0 }
 0xa40   :  { %v970_v17 = vadd.f32 %v969_v16, %v2251_v47  ;;  %v1824_v18 = vpop.f32.mrb[13].mxu0 }
 0xa42   :  { %2056 = vtanh.f32 %v970_v17 }
 0xa48   :  { %v2055_v19 = vpop.eup %2054 }
 0xa49   :  { %v1059_v20 = vmul.f32 %v2055_v19, %v2188_v13 }
 0xa4b   :  { %v1060_v22 = vadd.f32 %v1059_v20, %v2191_v14 }
 0xa4c   :  { %v2057_v23 = vpop.eup %2056 }
 0xa4d   :  { %1061 = vrot.lane.b32.xlu1 %v1060_v22, %s2133_s1  ;;  %v974_v29 = vmul.f32 %v2057_v23, %v2188_v13  ;;  %v1066_v35 = vmul.f32 %v1060_v22, %v896_v62 }
 0xa4f   :  { %v975_v24 = vadd.f32 %v974_v29, %v2191_v14 }
 0xa51   :  { %976 = vrot.lane.b32.xlu0 %v975_v24, %s2133_s1  ;;  %v981_v38 = vmul.f32 %v975_v24, %v811_v1 }
 0xabf   :  { %v1062_v30 = vpop.permute.xlu1 %1061 }
 0xac0   :  { %v1063_v32 = vmul.f32 %v1062_v30, %v1060_v22 }
 0xac2   :  { %1064 = vrot.lane.b32.xlu1 %v1063_v32, %s2132_s20 }
 0xac3   :  { %v977_v33 = vpop.permute.xlu0 %976 }
 0xac4   :  { %v978_v34 = vmul.f32 %v977_v33, %v975_v24 }
 0xac6   :  { %979 = vrot.lane.b32.xlu0 %v978_v34, %s2132_s20 }
 0xb34   :  { %v1065_v36 = vpop.permute.xlu1 %1064 }
 0xb35   :  { %v1067_v37 = vadd.f32 %v1066_v35, %v1065_v36 }
 0xb37   :  { %2058 = vtanh.f32 %v1067_v37 }
 0xb38   :  { %v980_v39 = vpop.permute.xlu0 %979 }
 0xb39   :  { %v982_v41 = vadd.f32 %v981_v38, %v980_v39 }
 0xb3b   :  { %2060 = vtanh.f32 %v982_v41 }
 0xb41   :  { %v2059_v43 = vpop.eup %2058 }
 0xb42   :  { %v1069_v46 = vmul.f32 %v2059_v43, %v1062_v30 }
 0xb44   :  { %1852 = vmatmul.mubr.msk.f32.vlgmr.msra.gmra.mrb[14].mxu0 %vm300_vm6, %v1069_v46 }
 0xb45   :  { %v2061_v48 = vpop.eup %2060  ;;  %1980 = vmatpush3.bf16.msra.mxu0 %v2205_v25  ;;  %1866 = vmatprep.mubr.msk.f32.mxu0 %vm2135_vm1, %v2136_v26 }
 0xb46   :  { %v984_v49 = vmul.f32 %v2061_v48, %v977_v33  ;;  %1981 = vmatprep.subr.bf16.mxu0 %v2134_v21 }
 0xb48   :  { %v1070_v50 = vsel %vm2227_vm4, %v984_v49, %v1069_v46 }
 0xb49   :  { %1845 = vmatmul.mubr.msk.f32.vlgmr.msra.gmra.mrb[14].mxu1 %vm214_vm5, %v1070_v50  ;;  %1983 = vmatpush3.bf16.msra.mxu0 %v2211_v27 }
 0xb4a   :  { %1989 = vmatpush3.bf16.msra.mxu1 %v2231_v42  ;;  %1873 = vmatprep.mubr.msk.f32.mxu1 %vm2135_vm1, %v2136_v26 }
 0xb4b   :  { %1984 = vmatprep.subr.bf16.mxu0 %v2134_v21  ;;  %1990 = vmatprep.subr.bf16.mxu1 %v2134_v21 }
 0xb4d   :  { %1986 = vmatpush3.bf16.msra.mxu0 %v2217_v31 }
 0xb4e   :  { %1999 = vmatprep.subr.bf16.mxu0 %v2134_v21 }
 0xc17   :  { %v1225_v52 = vpop.f32.mrb[14].mxu0 }
 0xc18   :  { %v1226_v53 = vadd.f32 %v1225_v52, %v193_v51  ;;  %v1853_v54 = vpop.f32.mrb[15].mxu0 }
 0xc1a   :  { %2062 = vtanh.f32 %v1226_v53 }
 0xc1c   :  { %v1140_v55 = vpop.f32.mrb[14].mxu1 }
 0xc1d   :  { %v1141_v42 = vadd.f32 %v1140_v55, %v2251_v47  ;;  %v1846_v28 = vpop.f32.mrb[15].mxu1 }
 0xc1e   :  { %v36_v28 = vld [vmem:[#allocation2 + $0x50] sm:$0xff] }
 0xc1f   :  { %2064 = vtanh.f32 %v1141_v42  ;;  %v35_v42 = vld [vmem:[#allocation2 + $0x48] sm:$0xff] }
 0xc24   :  { %v2063_v56 = vpop.eup %2062 }
 0xc25   :  { %v1230_v57 = vmul.f32 %v2063_v56, %v2188_v13  ;;  %v2000_v56 = vpack.c.bf16 %v36_v28, %v35_v42 }
 0xc27   :  { %v1231_v58 = vadd.f32 %v1230_v57, %v2191_v14  ;;  %v37_v57 = vld [vmem:[#allocation2 + $0x58] sm:$0xff] }
 0xc29   :  { %v2065_v59 = vpop.eup %2064  ;;  %1232 = vrot.lane.b32.xlu1 %v1231_v58, %s2133_s1  ;;  %v1237_v1 = vmul.f32 %v1231_v58, %v1067_v37 }
 0xc2a   :  { %v1145_v60 = vmul.f32 %v2065_v59, %v2188_v13  ;;  %v39_v59 = vld [vmem:[#allocation2 + $0x68] sm:$0xff] }
 0xc2c   :  { %v1146_v45 = vadd.f32 %v1145_v60, %v2191_v14 }
 0xc2e   :  { %1147 = vrot.lane.b32.xlu0 %v1146_v45, %s2133_s1  ;;  %v1152_v5 = vmul.f32 %v1146_v45, %v982_v41 }
 0xc9b   :  { %v1233_v61 = vpop.permute.xlu1 %1232 }
 0xc9c   :  { %v1234_v62 = vmul.f32 %v1233_v61, %v1231_v58  ;;  %v2003_v58 = vpack.c.bf16 %v38_v40, %v37_v57 }
 0xc9e   :  { %1235 = vrot.lane.b32.xlu1 %v1234_v62, %s2132_s20 }
 0xca0   :  { %v1148_v63 = vpop.permute.xlu0 %1147 }
 0xca1   :  { %v1149_v0 = vmul.f32 %v1148_v63, %v1146_v45 }
 0xca3   :  { %1150 = vrot.lane.b32.xlu0 %v1149_v0, %s2132_s20 }
 0xd10   :  { %v1236_v2 = vpop.permute.xlu1 %1235 }
 0xd11   :  { %v1238_v3 = vadd.f32 %v1237_v1, %v1236_v2  ;;  %v1500_v1 = vsub.s32 2, %v2174_v4 }
 0xd13   :  { %2066 = vtanh.f32 %v1238_v3  ;;  %v1501_v2 = vrot.slane %v2177_v6, %v1500_v1 }
 0xd15   :  { %v1151_v8 = vpop.permute.xlu0 %1150 }
 0xd16   :  { %v1153_v9 = vadd.f32 %v1152_v5, %v1151_v8 }
 0xd18   :  { %2068 = vtanh.f32 %v1153_v9 }
 0xd1d   :  { %v2067_v10 = vpop.eup %2066 }
 0xd1e   :  { %v1240_v11 = vmul.f32 %v2067_v10, %v1233_v61 }
 0xd20   :  { %1874 = vmatmul.mubr.msk.f32.vlgmr.msra.gmra.mrb[16].mxu1 %vm300_vm6, %v1240_v11 }
 0xd21   :  { %1992 = vmatpush3.bf16.msra.mxu1 %v2205_v25  ;;  %1888 = vmatprep.mubr.msk.f32.mxu1 %vm2135_vm1, %v2136_v26  ;;  %v198_v25 = vadd.f32 %v2245_v44, %v2180_v7 }
 0xd22   :  { %v2069_v12 = vpop.eup %2068  ;;  %1993 = vmatprep.subr.bf16.mxu1 %v2134_v21 }
 0xd23   :  { %v1155_v15 = vmul.f32 %v2069_v12, %v1148_v63 }
 0xd25   :  { %v1241_v16 = vsel %vm2227_vm4, %v1155_v15, %v1240_v11  ;;  %1995 = vmatpush3.bf16.msra.mxu1 %v2211_v27 }
 0xd26   :  { %1867 = vmatmul.mubr.msk.f32.vlgmr.msra.gmra.mrb[16].mxu0 %vm214_vm5, %v1241_v16  ;;  %1996 = vmatprep.subr.bf16.mxu1 %v2134_v21 }
 0xd27   :  { %1903 = vmatprep.mubr.msk.f32.mxu0 %vm2135_vm1, %v2136_v26  ;;  %2001 = vmatpush3.bf16.msra.mxu0 %v2000_v56 }
 0xd28   :  { %2002 = vmatprep.subr.bf16.mxu0 %v2134_v21 }
 0xd29   :  { %1998 = vmatpush3.bf16.msra.mxu1 %v2217_v31 }
 0xd2b   :  { %2004 = vmatpush3.bf16.msra.mxu0 %v2003_v58 }
 0xd2c   :  { %2005 = vmatprep.subr.bf16.mxu0 %v2134_v21 }
 0xdf3   :  { %v1396_v17 = vpop.f32.mrb[16].mxu1 }
 0xdf4   :  { %v1397_v18 = vadd.f32 %v1396_v17, %v198_v25  ;;  %v1875_v19 = vpop.f32.mrb[17].mxu1 }
 0xdf6   :  { %2070 = vtanh.f32 %v1397_v18 }
 0xdf9   :  { %v1311_v20 = vpop.f32.mrb[16].mxu0 }
 0xdfa   :  { %v1312_v22 = vadd.f32 %v1311_v20, %v2251_v47  ;;  %v1868_v27 = vpop.f32.mrb[17].mxu0 }
 0xdfc   :  { %2072 = vtanh.f32 %v1312_v22 }
 0xe00   :  { %v2071_v23 = vpop.eup %2070 }
 0xe01   :  { %v1401_v29 = vmul.f32 %v2071_v23, %v2188_v13 }
 0xe03   :  { %v1402_v24 = vadd.f32 %v1401_v29, %v2191_v14 }
 0xe05   :  { %1403 = vrot.lane.b32.xlu1 %v1402_v24, %s2133_s1  ;;  %v1408_v35 = vmul.f32 %v1402_v24, %v1238_v3 }
 0xe06   :  { %v2073_v26 = vpop.eup %2072 }
 0xe07   :  { %v1316_v31 = vmul.f32 %v2073_v26, %v2188_v13 }
 0xe09   :  { %v1317_v7 = vadd.f32 %v1316_v31, %v2191_v14 }
 0xe0b   :  { %1318 = vrot.lane.b32.xlu0 %v1317_v7, %s2133_s1  ;;  %v1323_v37 = vmul.f32 %v1317_v7, %v1153_v9 }
 0xe77   :  { %v1404_v44 = vpop.permute.xlu1 %1403 }
 0xe78   :  { %v1405_v30 = vmul.f32 %v1404_v44, %v1402_v24 }
 0xe7a   :  { %1406 = vrot.lane.b32.xlu1 %v1405_v30, %s2132_s20 }
 0xe7d   :  { %v1319_v32 = vpop.permute.xlu0 %1318 }
 0xe7e   :  { %v1320_v33 = vmul.f32 %v1319_v32, %v1317_v7 }
 0xe80   :  { %1321 = vrot.lane.b32.xlu0 %v1320_v33, %s2132_s20 }
 0xeec   :  { %v1407_v34 = vpop.permute.xlu1 %1406 }
 0xeed   :  { %v1409_v36 = vadd.f32 %v1408_v35, %v1407_v34 }
 0xeef   :  { %2074 = vtanh.f32 %v1409_v36 }
 0xef2   :  { %v1322_v38 = vpop.permute.xlu0 %1321 }
 0xef3   :  { %v1324_v39 = vadd.f32 %v1323_v37, %v1322_v38 }
 0xef5   :  { %2076 = vtanh.f32 %v1324_v39 }
 0xef9   :  { %v2075_v41 = vpop.eup %2074 }
 0xefa   :  { %v1411_v48 = vmul.f32 %v2075_v41, %v1404_v44 }
 0xeff   :  { %v2077_v43 = vpop.eup %2076 }
 0xf00   :  { %v1326_v46 = vmul.f32 %v2077_v43, %v1319_v32 }
 0xf02   :  { %v1412_v49 = vsel %vm2227_vm4, %v1326_v46, %v1411_v48 }
 0xf03   :  { %1889 = vmatmul.mubr.msk.f32.vlgmr.msra.gmra.mrb[18].mxu1 %vm214_vm5, %v1412_v49 }
 0xfd6   :  { %v1482_v50 = vpop.f32.mrb[18].mxu1 }
 0xfd7   :  { %v1483_v51 = vadd.f32 %v1482_v50, %v2251_v47  ;;  %v1890_v52 = vpop.f32.mrb[19].mxu1  ;;  %v40_v47 = vld [vmem:[#allocation2 + $0x70] sm:$0xff] }
 0xfd8   :  { %v2006_v60 = vpack.c.bf16 %v40_v47, %v39_v59 }
 0xfd9   :  { %2078 = vtanh.f32 %v1483_v51 }
 0xfda   :  { %2007 = vmatpush3.bf16.msra.mxu0 %v2006_v60 }
 0xfe3   :  { %v2079_v53 = vpop.eup %2078 }
 0xfe4   :  { %v1487_v54 = vmul.f32 %v2079_v53, %v2188_v13 }
 0xfe6   :  { %v1488_v55 = vadd.f32 %v1487_v54, %v2191_v14 }
 0xfe8   :  { %1489 = vrot.lane.b32.xlu0 %v1488_v55, %s2133_s1  ;;  %v1494_v14 = vmul.f32 %v1488_v55, %v1324_v39 }
0x105a   :  { %v1490_v13 = vpop.permute.xlu0 %1489 }
0x105b   :  { %v1491_v45 = vmul.f32 %v1490_v13, %v1488_v55 }
0x105d   :  { %1492 = vrot.lane.b32.xlu1 %v1491_v45, %s2132_s20 }
0x10cf   :  { %v1493_v61 = vpop.permute.xlu1 %1492 }
0x10d0   :  { %v1495_v62 = vadd.f32 %v1494_v14, %v1493_v61 }
0x10d2   :  { %2080 = vtanh.f32 %v1495_v62 }
0x10dc   :  { %v2081_v63 = vpop.eup %2080 }
0x10dd   :  { %v1497_v0 = vmul.f32 %v2081_v63, %v1490_v13 }
0x10df   :  { %1904 = vmatmul.mubr.msk.f32.vlgmr.msra.gmra.mrb[18].mxu0 %vm214_vm5, %v1497_v0 }
0x11b2   :  { %v1571_v21 = vpop.f32.mrb[18].mxu0 }
0x11b3   :  { %v1572_v3 = vadd.f32 %v1571_v21, %v1501_v2  ;;  %v1905_v5 = vpop.f32.mrb[19].mxu0 }
0x11b5   :  { %1575 = vst [vmem:[#allocation5] sm:$0xff] %v1572_v3 }
0x11b6   :  { %2115 = shalt.err (!%p2112_p12)
}
0x11b7   :  { %s2116_s15 = scalar_lea.hbm %s2470_s2, 128 }
0x11b8   :  { %p2117_p13 = scmp.ne.s32.totalorder %s2470_s2, %s2116_s15  ;;  %p2120_p0 = scmp.lt.u32.totalorder %s2116_s15, %s2470_s2 }
0x11ba   :  { %p2122_p1 = pnand %p2120_p0, %p2117_p13 }
0x11bc   :  { %2125 = shalt.err (!%p2122_p1)
}
0x11bd   :  { %1585 = dma.vmem_to_hbm [thread:$0]  %s1583_s11, 128, %s2470_s2, [#allocation4]  }
0x11be   :  { %2128 = dma.done.wait [#allocation4], 128  }
0x11bf   :  { %2129 = vsyncadd [#allocation4], 4294967168 }
0x11c0   :  { %1589 = vsyncpa [#allocation3], 1 }
0x11c1   :  { %1590 = vsyncpa [#allocation4], 1 }

</bundles_post_ra>
